<compile_context>
chip_gen: v6e
topology: v6e:2x2x1
jax: 0.10.0
libtpu: 0.0.40
codegen_flags: <defaults>
</compile_context>

<pallas_src>
import functools

import jax
import jax.numpy as jnp
from jax.experimental import pallas as pl
from jax.experimental.pallas import tpu as pltpu

_LANES = 128


def _round_up(x, m):
    return (x + m - 1) // m * m


# --------------------------------------------------------------------------
# Pallas kernel: fused (x - label)^2 sum-reduction + mean
# --------------------------------------------------------------------------

def _gan_mse_kernel(label_ref, x_ref, out_ref, acc_ref, *,
                    n_valid, tile_elems, mask_needed, inv_n):
    """Streams lane-dense tiles, accumulates (x - label)^2 in f32.

    label_ref : SMEM f32[1]        -- scalar label (is_d_input_real as float)
    x_ref     : VMEM   [tm, 128]   -- one lane-dense tile (native dtype)
    out_ref   : SMEM f32[1, 1]     -- final scalar loss (written on last step)
    acc_ref   : VMEM f32[8, 128]   -- resident per-vreg accumulator (scratch)
    """
    i = pl.program_id(0)
    last = pl.num_programs(0) - 1

    @pl.when(i == 0)
    def _():
        acc_ref[...] = jnp.zeros_like(acc_ref)

    x = x_ref[...].astype(jnp.float32)   # upcast happens in vregs
    tm = x.shape[0]
    d = x - label_ref[0]
    d2 = d * d

    def accumulate(vals):
        if tm % 8 == 0:
            # Free reshape (splits the sublane axis on a vreg boundary);
            # the sum over axis 0 is pure VALU vreg adds — the cross-sublane
            # XLU reduce is deferred to the final step.
            acc_ref[...] += jnp.sum(vals.reshape(tm // 8, 8, _LANES), axis=0)
        else:
            # Tiny single-block fallback: whole array smaller than one
            # sublane tile; only the first accumulator row is used.
            acc_ref[0:1, :] += jnp.sum(vals, axis=0, keepdims=True)

    if mask_needed:
        # Only the LAST tile can contain pad / out-of-bounds garbage: mask
        # there, every other tile takes the unmasked fast path.
        @pl.when(i == last)
        def _():
            base = i * tile_elems
            ridx = jax.lax.broadcasted_iota(jnp.int32, d2.shape, 0)
            lidx = jax.lax.broadcasted_iota(jnp.int32, d2.shape, 1)
            valid = (base + ridx * _LANES + lidx) < n_valid
            accumulate(jnp.where(valid, d2, 0.0))

        @pl.when(i != last)
        def _():
            accumulate(d2)
    else:
        accumulate(d2)

    @pl.when(i == last)
    def _():
        # Folded epilogue: one cross-sublane + cross-lane reduce, scale by
        # the compile-time constant 1/n, write the scalar result.
        out_ref[0, 0] = jnp.sum(acc_ref[...]) * inv_n


# --------------------------------------------------------------------------
# Public wrapper — GANLoss.forward
# --------------------------------------------------------------------------

def gan_loss_pallas(d_last_layer, is_d_input_real, *, block_rows=2048):
    """mean((d_last_layer - float(is_d_input_real))**2), fused on TPU."""
    x = jnp.ravel(d_last_layer)
    n = x.shape[0]
    label = jnp.asarray(is_d_input_real, jnp.float32).reshape(1)

    rows = pl.cdiv(n, _LANES)

    # Min sublane tile depends on dtype packing (f32: 8, bf16: 16, int8: 32).
    itemsize = jnp.dtype(x.dtype).itemsize
    sub = {4: 8, 2: 16, 1: 32}.get(itemsize, 8)

    # Pad only the ragged lane tail (no pad at all when n % 128 == 0, in
    # which case the reshape below is a free bitcast). Native dtype is kept.
    pad = rows * _LANES - n
    if pad:
        x = jnp.pad(x, (0, pad))
    x2d = x.reshape(rows, _LANES)

    if rows >= sub:
        tm = min(_round_up(block_rows, sub), (rows // sub) * sub)
    else:
        tm = rows  # single block equal to the full array dims
    num_steps = pl.cdiv(rows, tm)
    # Mask needed iff the blocks cover any element index >= n (explicit pad
    # and/or the ragged garbage tail of the last block).
    mask_needed = (num_steps * tm * _LANES != n)

    kernel = functools.partial(
        _gan_mse_kernel,
        n_valid=n,
        tile_elems=tm * _LANES,
        mask_needed=mask_needed,
        inv_n=1.0 / n,
    )

    out = pl.pallas_call(
        kernel,
        out_shape=jax.ShapeDtypeStruct((1, 1), jnp.float32),
        grid=(num_steps,),
        in_specs=[
            pl.BlockSpec(memory_space=pltpu.MemorySpace.SMEM),   # label scalar
            pl.BlockSpec((tm, _LANES), lambda i: (i, 0)),        # data tiles
        ],
        out_specs=pl.BlockSpec(memory_space=pltpu.MemorySpace.SMEM),  # scalar
        scratch_shapes=[pltpu.VMEM((8, _LANES), jnp.float32)],   # resident acc
        compiler_params=pltpu.CompilerParams(
            dimension_semantics=("arbitrary",)),                 # reduction
    )(label, x2d)

    return out[0, 0]


# --------------------------------------------------------------------------

if __name__ == "__main__":
    key = jax.random.PRNGKey(0)
    # discriminator last-layer patch output (N, C, H, W)
    d_last = jax.random.normal(key, (2, 4, 16, 16), jnp.float32)

    # real / fake label paths (single tile, no mask, no pad)
    for is_real in (True, False):
        loss = jax.block_until_ready(gan_loss_pallas(d_last, is_real))
        label = jnp.float32(1.0 if is_real else 0.0)
        ref = jnp.mean((d_last - label) ** 2)
        assert loss.shape == (), loss.shape
        assert bool(jnp.isfinite(loss))
        assert bool(jnp.allclose(loss, ref, rtol=1e-6, atol=1e-6)), (loss, ref)

    # multi-step grid path (accumulation across tiles, unmasked)
    loss_mt = jax.block_until_ready(gan_loss_pallas(d_last, True, block_rows=8))
    ref_mt = jnp.mean((d_last - 1.0) ** 2)
    assert bool(jnp.allclose(loss_mt, ref_mt, rtol=1e-6, atol=1e-6))

    # ragged element count: exercises the minimal tail pad + last-tile mask
    d_rag = jax.random.normal(jax.random.PRNGKey(1), (3, 5, 7, 11), jnp.float32)
    loss_rg = jax.block_until_ready(gan_loss_pallas(d_rag, False, block_rows=8))
    ref_rg = jnp.mean(d_rag ** 2)
    assert bool(jnp.allclose(loss_rg, ref_rg, rtol=1e-6, atol=1e-6))

    # native bf16 streaming (half the HBM bytes; upcast happens in-vreg)
    d_bf16 = d_last.astype(jnp.bfloat16)
    loss_bf = jax.block_until_ready(gan_loss_pallas(d_bf16, True))
    ref_bf = jnp.mean((d_bf16.astype(jnp.float32) - 1.0) ** 2)
    assert bool(jnp.allclose(loss_bf, ref_bf, rtol=1e-5, atol=1e-5))

    print("KERNEL_OK")
</pallas_src>

<mosaic_0001>
module attributes {stable_mosaic.version = 11 : i64} {
  func.func @_gan_mse_kernel(%arg0: i32, %arg1: memref<1xf32, #tpu.memory_space<smem>>, %arg2: memref<16x128xf32, #tpu.memory_space<vmem>>, %arg3: memref<1x1xf32, #tpu.memory_space<smem>>, %arg4: memref<8x128xf32, #tpu.memory_space<vmem>>) attributes {dimension_semantics = [#tpu.dimension_semantics<arbitrary>], iteration_bounds = array<i64: 1>, scalar_prefetch = 0 : i64, scratch_operands = 1 : i64, tpu.core_type = #tpu.core_type<tc>, window_params = [{transform_indices = @transform_0, window_bounds = array<i64: 1>}, {transform_indices = @transform_1, window_bounds = array<i64: 16, 128>}, {transform_indices = @transform_2, window_bounds = array<i64: 1, 1>}]} {
    %c0_i32 = arith.constant 0 : i32
    %0 = arith.cmpi eq, %arg0, %c0_i32 : i32
    %1 = arith.extui %0 : i1 to i32
    %c0_i32_0 = arith.constant 0 : i32
    %2 = arith.cmpi ne, %1, %c0_i32_0 : i32
    scf.if %2 {
      %cst_9 = arith.constant 0.000000e+00 : f32
      %16 = vector.broadcast %cst_9 : f32 to vector<8x128xf32>
      %c0_10 = arith.constant 0 : index
      %c0_11 = arith.constant 0 : index
      %17 = vector.load %arg4[%c0_10, %c0_11] : memref<8x128xf32, #tpu.memory_space<vmem>>, vector<8x128xf32>
      tpu.vector_store %arg4[%c0_10, %c0_11], %16 {strides = array<i32>} : memref<8x128xf32, #tpu.memory_space<vmem>>, vector<8x128xf32>,
    } else {
    }
    %c0 = arith.constant 0 : index
    %c0_1 = arith.constant 0 : index
    %3 = vector.load %arg2[%c0, %c0_1] : memref<16x128xf32, #tpu.memory_space<vmem>>, vector<16x128xf32>
    %c0_2 = arith.constant 0 : index
    %4 = memref.load %arg1[%c0_2] : memref<1xf32, #tpu.memory_space<smem>>
    %5 = vector.broadcast %4 : f32 to vector<16x128xf32>
    %6 = arith.subf %3, %5 : vector<16x128xf32>
    %7 = arith.mulf %6, %6 : vector<16x128xf32>
    %c0_3 = arith.constant 0 : index
    %c0_4 = arith.constant 0 : index
    %8 = vector.load %arg4[%c0_3, %c0_4] : memref<8x128xf32, #tpu.memory_space<vmem>>, vector<8x128xf32>
    %9 = vector.shape_cast %7 : vector<16x128xf32> to vector<2x8x128xf32>
    %cst = arith.constant dense<0.000000e+00> : vector<8x128xf32>
    %10 = vector.multi_reduction <add>, %9, %cst [0] : vector<2x8x128xf32> to vector<8x128xf32>
    %11 = arith.addf %8, %10 : vector<8x128xf32>
    %c0_5 = arith.constant 0 : index
    %c0_6 = arith.constant 0 : index
    %12 = vector.load %arg4[%c0_5, %c0_6] : memref<8x128xf32, #tpu.memory_space<vmem>>, vector<8x128xf32>
    tpu.vector_store %arg4[%c0_5, %c0_6], %11 {strides = array<i32>} : memref<8x128xf32, #tpu.memory_space<vmem>>, vector<8x128xf32>,
    %c0_i32_7 = arith.constant 0 : i32
    %13 = arith.cmpi eq, %arg0, %c0_i32_7 : i32
    %14 = arith.extui %13 : i1 to i32
    %c0_i32_8 = arith.constant 0 : i32
    %15 = arith.cmpi ne, %14, %c0_i32_8 : i32
    scf.if %15 {
      %c0_9 = arith.constant 0 : index
      %c0_10 = arith.constant 0 : index
      %16 = vector.load %arg4[%c0_9, %c0_10] : memref<8x128xf32, #tpu.memory_space<vmem>>, vector<8x128xf32>
      %17 = vector.shape_cast %16 : vector<8x128xf32> to vector<1x8x128xf32>
      %cst_11 = arith.constant dense<0.000000e+00> : vector<1xf32>
      %18 = vector.multi_reduction <add>, %17, %cst_11 [1, 2] : vector<1x8x128xf32> to vector<1xf32>
      %19 = vector.shape_cast %18 : vector<1xf32> to vector<1x1x1xf32>
      %20 = vector.extract %19[0, 0, 0] : f32 from vector<1x1x1xf32>
      %cst_12 = arith.constant 4.8828125E-4 : f32
      %21 = arith.mulf %20, %cst_12 : f32
      %c0_13 = arith.constant 0 : index
      %c0_14 = arith.constant 0 : index
      %22 = memref.load %arg3[%c0_13, %c0_14] : memref<1x1xf32, #tpu.memory_space<smem>>
      memref.store %21, %arg3[%c0_13, %c0_14] : memref<1x1xf32, #tpu.memory_space<smem>>
    } else {
    }
    return
  }
  func.func @transform_0(%arg0: i32) -> i32 {
    %c0_i32 = arith.constant 0 : i32
    %c0_i32_0 = arith.constant 0 : i32
    return %c0_i32 : i32
  }
  func.func @transform_1(%arg0: i32) -> (i32, i32) {
    %c0_i32 = arith.constant 0 : i32
    %c0_i32_0 = arith.constant 0 : i32
    return %arg0, %c0_i32 : i32, i32
  }
  func.func @transform_2(%arg0: i32) -> (i32, i32) {
    %c0_i32 = arith.constant 0 : i32
    %c0_i32_0 = arith.constant 0 : i32
    %c0_i32_1 = arith.constant 0 : i32
    return %c0_i32, %c0_i32_0 : i32, i32
  }
}

</mosaic_0001>

<bundles_post_ra>
// kernel: tpu_custom_call.1
= control target key start
LH: loop header
LB: loop body
LE: loop exit
PB: predicated region body
PF: predicated region fallthrough
CT: control target
= control target key end

     0   :  { %8 = vsyncpa [#allocation5], 0  ;;  %s140_s0 = inlined_call_operand.<no memory space> [shape: f32[1], index: 0, kind: input, shape index: {}]   ;;  %s141_s1 = inlined_call_operand.hbm [shape: f32[16,128], index: 1, kind: input, shape index: {}]   ;;  %s142_s2 = inlined_call_operand.hbm [shape: f32[1,1], index: 2, kind: output, shape index: {}]  }
   0x1   :  { %9 = vsyncpa [#allocation6], 0  ;;  %s112_s9 = smov [#allocation4]  }
   0x2   :  { %s17_s10 = sshll.u32 %s112_s9, 4  ;;  %s18_s10 = int_to_ptr.vmem [resolvable:$true] %s17_s10 }
   0x3   :  { %s88_s11 = scalar_lea.vmem %s18_s10, 256  ;;  %p93_p1 = scmp.lt.s32.totalorder %s18_s10, %s18_s10 }
   0x4   :  { %p89_p0 = scmp.ne.s32.totalorder %s18_s10, %s88_s11  ;;  %p94_p2 = scmp.lt.s32.totalorder %s88_s11, %s88_s11 }
   0x6   :  { %p95_p3 = por %p94_p2, %p93_p1 }
   0x8   :  { %p96_p4 = pnand %p95_p3, %p89_p0 }
   0xa   :  { %99 = shalt.err (!%p96_p4)
}
   0xb   :  { %s113_s12 = smov 128   ;;  %s114_s13 = smov 8  }
   0xc   :  { %23 = dma.hbm_to_vmem [thread:$0]  %s141_s1, 256, %s18_s10, [#allocation5], %s113_s12, %s113_s12, %s114_s13  }
   0xd   :  { %108 = dma.done.wait [#allocation5], 256  }
   0xe   :  { %109 = vsyncadd [#allocation5], 4294967040  ;;  %v35_v0 = vstv %s140_s0  ;;  %v32_v1 = vld [vmem:[#allocation4] sm:$0xff]  ;;  %v33_v2 = vld [vmem:[#allocation4 + $0x8] sm:$0xff]  ;;  %s115_s0 = smov [#allocation7]  }
   0xf   :  { %v36_v3 = vsub.f32 %v32_v1, %v35_v0  ;;  %v37_v4 = vsub.f32 %v33_v2, %v35_v0 }
  0x11   :  { %v38_v5 = vmul.f32 %v36_v3, %v36_v3  ;;  %v39_v6 = vmul.f32 %v37_v4, %v37_v4 }
  0x13   :  { %v41_v7 = vadd.f32 %v39_v6, %v38_v5 }
  0x15   :  { %48 = vadd.xlane.f32.xlu0 %v41_v7 }
  0x9e   :  { %v49_v8 = vpop.xlane.xlu0 %48 }
  0x9f   :  { %v50_v9 = vrot.slane %v49_v8, 4 }
  0xa1   :  { %v51_v10 = vadd.f32 %v50_v9, %v49_v8 }
  0xa3   :  { %v52_v11 = vrot.slane %v51_v10, 2 }
  0xa5   :  { %v53_v12 = vadd.f32 %v52_v11, %v51_v10 }
  0xa7   :  { %v54_v13 = vrot.slane %v53_v12, 1 }
  0xa9   :  { %v55_v14 = vadd.f32 %v54_v13, %v53_v12 }
  0xab   :  { %74 = vpush %v55_v14 }
  0xdc   :  { %s75_s1 = spop %74 }
  0xdd   :  { %s57_s18 = smul.f32 0.00048828125, %s75_s1 }
  0xdf   :  { %59 = sst [smem:[#allocation7]] %s57_s18 }
  0xe0   :  { %67 = dma.smem_to_hbm %s115_s0, 16, %s142_s2, [#allocation6]  }
  0xe1   :  { %110 = dma.done.wait [#allocation6], 16  }
  0xe2   :  { %111 = vsyncadd [#allocation6], 4294967280 }
  0xe3   :  { %71 = sfence }
  0xe4   :  { %72 = vsyncpa [#allocation5], 1 }
  0xe5   :  { %73 = vsyncpa [#allocation6], 1 }

</bundles_post_ra>
